<compile_context>
chip_gen: v6e
topology: v6e:2x2x1
jax: 0.10.0
libtpu: 0.0.40
codegen_flags: <defaults>
</compile_context>

<pallas_src>
import functools
import math

import jax
import jax.numpy as jnp
from jax import lax
from jax.experimental import pallas as pl
from jax.experimental.pallas import tpu as pltpu


_INV_SQRT2 = 1.0 / math.sqrt(2.0)


def _gelu_exact(x):
    # PyTorch F.gelu default: 0.5 * x * (1 + erf(x / sqrt(2)))
    return 0.5 * x * (1.0 + lax.erf(x * _INV_SQRT2))


def _gelu_tanh(x):
    # tanh-approximate GELU (uses the EUP slot); opt-in, differs from torch default.
    return jax.nn.gelu(x, approximate=True)


def _round_up(v, m):
    return ((v + m - 1) // m) * m


def _mlp_kernel(x_ref, w1_ref, b1_ref, w2_ref, b2_ref, o_ref, h_ref,
                *, hid_dim, hid_pad, approx_gelu):
    # Phase 1 (once per row tile, j == 0): fc1 + GELU + LayerNorm -> VMEM scratch.
    # Matmul inputs stay in storage dtype (bf16 fast path), f32 MXU accumulation;
    # elementwise math in f32 (v5e has no bf16 VPU/EUP).
    @pl.when(pl.program_id(1) == 0)
    def _():
        h = jnp.dot(x_ref[...], w1_ref[...], preferred_element_type=jnp.float32)
        h = h + b1_ref[...].astype(jnp.float32)
        h = _gelu_tanh(h) if approx_gelu else _gelu_exact(h)

        # LayerNorm over the *real* hidden dim (eps=1e-6, identity affine).
        # Padded columns are exactly zero after fc1 + GELU, so plain sums are exact.
        mean = jnp.sum(h, axis=-1, keepdims=True) / hid_dim
        centered = h - mean
        if hid_pad > hid_dim:
            valid = lax.broadcasted_iota(jnp.int32, (1, hid_pad), 1) < hid_dim
            centered = jnp.where(valid, centered, 0.0)
        var = jnp.sum(centered * centered, axis=-1, keepdims=True) / hid_dim
        hn = centered * lax.rsqrt(var + 1e-6)

        # dropout(p=0.0) / eval mode -> identity.
        # TODO(synk): training-mode dropout (p>0) would need pltpu.prng_seed/prng_random_bits.

        # Store in the fc2-weight dtype so bf16 weights keep the fast MXU input path.
        h_ref[...] = hn.astype(h_ref.dtype)

    # Phase 2 (per column tile): fc2 on the MXU from the resident scratch.
    # TODO(synk): for MXU-bound large-H cases, split the row tile into two half
    # chains so GELU/LayerNorm of one half overlaps fc1/fc2 of the other.
    y = jnp.dot(h_ref[...], w2_ref[...], preferred_element_type=jnp.float32)
    y = y + b2_ref[...].astype(jnp.float32)
    o_ref[...] = y.astype(o_ref.dtype)


def pad_params(w1, b1, w2, b2):
    """Pad weights/biases to lane-dense (multiple-of-128) feature dims, once.

    w1 : (Din, H)   b1 : (H,) or (1, H)
    w2 : (H, H)     b2 : (H,) or (1, H)
    Weights are (in_features, out_features) — transposed vs. torch nn.Linear.
    """
    Din, H = w1.shape
    assert w2.shape == (H, H), (w1.shape, w2.shape)
    b1 = jnp.reshape(b1, (1, H))
    b2 = jnp.reshape(b2, (1, H))
    Dp = _round_up(Din, 128)
    Hp = _round_up(H, 128)
    w1p = jnp.pad(w1, ((0, Dp - Din), (0, Hp - H))) if (Dp != Din or Hp != H) else w1
    b1p = jnp.pad(b1, ((0, 0), (0, Hp - H))) if Hp != H else b1
    w2p = jnp.pad(w2, ((0, Hp - H), (0, Hp - H))) if Hp != H else w2
    b2p = jnp.pad(b2, ((0, 0), (0, Hp - H))) if Hp != H else b2
    return dict(w1=w1p, b1=b1p, w2=w2p, b2=b2p, input_dim=Din, hid_dim=H)


def _vmem_capacity_bytes():
    try:
        return int(getattr(pltpu.get_tpu_info(), "vmem_capacity_bytes", 64 << 20))
    except Exception:
        return 64 << 20  # conservative (v7x per-TC)


def mlp_apply(x, params, *, tm=512, approx_gelu=False,
              max_vmem_bytes=None, force_cols=None):
    """Fused MLP forward with pre-padded parameters (see pad_params)."""
    w1p, b1p, w2p, b2p = params["w1"], params["b1"], params["w2"], params["b2"]
    Din, H = params["input_dim"], params["hid_dim"]
    Dp, Hp = w1p.shape
    N, Dx = x.shape
    assert Dx == Din, (Dx, Din)

    # Per-chip VMEM budget (used for tile selection).
    vmem_cap = _vmem_capacity_bytes()
    budget = int(0.8 * vmem_cap) if max_vmem_bytes is None else int(max_vmem_bytes)

    # Row tile: multiple of 16 for 2-byte dtypes (sublane packing), 32 for 1-byte,
    # 8 otherwise.  Keep >= 2 row steps so the "parallel" axis shards across
    # TensorCores on v7x (cheap no-op on single-TC v5e/v6e).
    if x.dtype.itemsize == 2:
        row_mult = 16
    elif x.dtype.itemsize == 1:
        row_mult = 32
    else:
        row_mult = 8
    tm = max(row_mult, min(tm, _round_up(N, row_mult)))
    if N > row_mult:
        tm = min(tm, _round_up(pl.cdiv(N, 2), row_mult))
    tm = _round_up(tm, row_mult)
    Np = _round_up(N, tm)

    w_item = w1p.dtype.itemsize
    x_item = x.dtype.itemsize
    out_item = x.dtype.itemsize
    h_item = w2p.dtype.itemsize  # scratch stored in fc2-weight dtype

    def vmem_needed(tn, n_cols):
        w2_buf = 1 if n_cols == 1 else 2                 # streamed w2 is double-buffered
        return (
            Dp * Hp * w_item + Hp * w_item                # w1, b1 single-buffered
            + w2_buf * (Hp * tn + tn) * w_item            # w2, b2
            + 2 * tm * Dp * x_item                        # double-buffered x tile
            + 2 * tm * tn * out_item                      # double-buffered out tile
            + tm * Hp * h_item                            # normalized-activation scratch
            + 4 * tm * Hp * 4                             # f32 elementwise headroom
        )

    # Column tile for fc2: keep w2 fully resident if it fits the budget, else
    # stream column tiles (tn a 128-multiple divisor of Hp).
    h_blocks = Hp // 128
    if force_cols is not None:
        assert h_blocks % force_cols == 0, (Hp, force_cols)
        n_cols = int(force_cols)
    else:
        n_cols = h_blocks
        for cand in range(1, h_blocks + 1):
            if h_blocks % cand != 0:
                continue
            if vmem_needed(Hp // cand, cand) <= budget:
                n_cols = cand
                break
    tn = Hp // n_cols
    # TODO(synk): if even tn=128 overflows (huge Din/H), also tile fc1 over Dp
    # (K grid axis with an f32 accumulator) and shrink tm.

    needed = vmem_needed(tn, n_cols)
    vmem_limit = int(min(max(needed + (2 << 20), 16 << 20), int(0.9 * vmem_cap)))

    xp = jnp.pad(x, ((0, Np - N), (0, Dp - Din))) if (Np != N or Dp != Din) else x

    invariant = pl.Buffered(1)
    w2_mode = pl.Buffered(1) if n_cols == 1 else pl.Buffered(2)

    cost = pl.CostEstimate(
        flops=2 * N * (Din * H + H * H),
        transcendentals=N * H,  # erf / tanh
        bytes_accessed=(
            x.size * x_item
            + w1p.size * w_item
            + w2p.size * w_item
            + (b1p.size + b2p.size) * w_item
            + N * H * out_item
        ),
    )

    kernel = functools.partial(_mlp_kernel, hid_dim=H, hid_pad=Hp,
                               approx_gelu=approx_gelu)

    out = pl.pallas_call(
        kernel,
        out_shape=jax.ShapeDtypeStruct((Np, Hp), x.dtype),
        grid_spec=pltpu.PrefetchScalarGridSpec(
            num_scalar_prefetch=0,
            grid=(Np // tm, Hp // tn),
            in_specs=[
                pl.BlockSpec((tm, Dp), lambda i, j: (i, 0)),
                pl.BlockSpec((Dp, Hp), lambda i, j: (0, 0), pipeline_mode=invariant),
                pl.BlockSpec((1, Hp), lambda i, j: (0, 0), pipeline_mode=invariant),
                pl.BlockSpec((Hp, tn), lambda i, j: (0, j), pipeline_mode=w2_mode),
                pl.BlockSpec((1, tn), lambda i, j: (0, j), pipeline_mode=w2_mode),
            ],
            out_specs=pl.BlockSpec((tm, tn), lambda i, j: (i, j)),
            scratch_shapes=[pltpu.VMEM((tm, Hp), w2p.dtype)],
        ),
        compiler_params=pltpu.CompilerParams(
            dimension_semantics=("parallel", "arbitrary"),
            vmem_limit_bytes=vmem_limit,
        ),
        cost_estimate=cost,
    )(xp, w1p, b1p, w2p, b2p)

    return out[:N, :H]


def mlp_forward(x, w1, b1, w2, b2, **kwargs):
    """Convenience wrapper: pads parameters per call. For repeated calls with the
    same parameters, call pad_params() once and use mlp_apply() directly."""
    return mlp_apply(x, pad_params(w1, b1, w2, b2), **kwargs)


def xavier_uniform(key, fan_in, fan_out, dtype=jnp.float32):
    # matches torch.nn.init.xavier_uniform_ (gain=1)
    limit = math.sqrt(6.0 / (fan_in + fan_out))
    return jax.random.uniform(key, (fan_in, fan_out), dtype, -limit, limit)


def reference_forward(x, w1, b1, w2, b2):
    h = x @ w1 + jnp.reshape(b1, (1, -1))
    h = _gelu_exact(h)
    mean = jnp.mean(h, axis=-1, keepdims=True)
    var = jnp.mean((h - mean) ** 2, axis=-1, keepdims=True)
    h = (h - mean) * lax.rsqrt(var + 1e-6)
    return h @ w2 + jnp.reshape(b2, (1, -1))


if __name__ == "__main__":
    key = jax.random.PRNGKey(0)
    k_x, k_w1, k_b1, k_w2, k_b2, k_x2, k_w1b, k_b1b, k_w2b, k_b2b = jax.random.split(key, 10)

    # --- Test 1: small, not 128-aligned (exercises padding + masked LayerNorm) ---
    N, input_dim, hid_dim = 64, 48, 96
    x = jax.random.normal(k_x, (N, input_dim), jnp.float32)
    w1 = xavier_uniform(k_w1, input_dim, hid_dim)          # (in, out) layout
    b1 = (1e-6 * jax.random.normal(k_b1, (hid_dim,))).astype(jnp.float32)
    w2 = xavier_uniform(k_w2, hid_dim, hid_dim)
    b2 = (1e-6 * jax.random.normal(k_b2, (hid_dim,))).astype(jnp.float32)

    ref = reference_forward(x, w1, b1, w2, b2)

    params = pad_params(w1, b1, w2, b2)           # hoisted, pad once
    out = jax.block_until_ready(mlp_apply(x, params))
    assert out.shape == (N, hid_dim)
    assert jnp.allclose(out, ref, atol=1e-4, rtol=1e-4), \
        float(jnp.max(jnp.abs(out - ref)))

    # --- Test 2: bf16 fast path (bf16 MXU inputs, f32 accumulation + f32 GELU/LN) ---
    bf = jnp.bfloat16
    out_bf = jax.block_until_ready(
        mlp_forward(x.astype(bf), w1.astype(bf), b1.astype(bf),
                    w2.astype(bf), b2.astype(bf)))
    assert out_bf.dtype == bf and out_bf.shape == (N, hid_dim)
    assert jnp.allclose(out_bf.astype(jnp.float32), ref, atol=1e-1, rtol=5e-2), \
        float(jnp.max(jnp.abs(out_bf.astype(jnp.float32) - ref)))

    # --- Test 3: force the streamed-w2 (column-tiled) fc2 path ---
    N2, D2, H2 = 96, 160, 256
    x2 = jax.random.normal(k_x2, (N2, D2), jnp.float32)
    w1b = xavier_uniform(k_w1b, D2, H2)
    b1b = (1e-6 * jax.random.normal(k_b1b, (H2,))).astype(jnp.float32)
    w2b = xavier_uniform(k_w2b, H2, H2)
    b2b = (1e-6 * jax.random.normal(k_b2b, (H2,))).astype(jnp.float32)

    ref2 = reference_forward(x2, w1b, b1b, w2b, b2b)
    out2 = jax.block_until_ready(
        mlp_forward(x2, w1b, b1b, w2b, b2b, force_cols=2))
    assert out2.shape == (N2, H2)
    assert jnp.allclose(out2, ref2, atol=1e-3, rtol=1e-3), \
        float(jnp.max(jnp.abs(out2 - ref2)))

    print("KERNEL_OK")
</pallas_src>

<mosaic_0001>
module attributes {stable_mosaic.version = 11 : i64} {
  func.func @_mlp_kernel(%arg0: i32, %arg1: i32, %arg2: memref<32x128xf32, #tpu.memory_space<vmem>>, %arg3: memref<128x128xf32, #tpu.memory_space<vmem>>, %arg4: memref<1x128xf32, #tpu.memory_space<vmem>>, %arg5: memref<128x128xf32, #tpu.memory_space<vmem>>, %arg6: memref<1x128xf32, #tpu.memory_space<vmem>>, %arg7: memref<32x128xf32, #tpu.memory_space<vmem>>, %arg8: memref<32x128xf32, #tpu.memory_space<vmem>>) attributes {dimension_semantics = [#tpu.dimension_semantics<parallel>, #tpu.dimension_semantics<arbitrary>], iteration_bounds = array<i64: 2, 1>, scalar_prefetch = 0 : i64, scratch_operands = 1 : i64, tpu.core_type = #tpu.core_type<tc>, window_params = [{transform_indices = @transform_0, window_bounds = array<i64: 32, 128>}, {pipeline_mode = #tpu.pipeline_mode<synchronous>, transform_indices = @transform_1, window_bounds = array<i64: 128, 128>}, {pipeline_mode = #tpu.pipeline_mode<synchronous>, transform_indices = @transform_2, window_bounds = array<i64: 1, 128>}, {pipeline_mode = #tpu.pipeline_mode<synchronous>, transform_indices = @transform_3, window_bounds = array<i64: 128, 128>}, {pipeline_mode = #tpu.pipeline_mode<synchronous>, transform_indices = @transform_4, window_bounds = array<i64: 1, 128>}, {transform_indices = @transform_5, window_bounds = array<i64: 32, 128>}]} {
    %c0_i32 = arith.constant 0 : i32
    %0 = arith.cmpi eq, %arg1, %c0_i32 : i32
    %1 = arith.extui %0 : i1 to i32
    %c0_i32_0 = arith.constant 0 : i32
    %2 = arith.cmpi ne, %1, %c0_i32_0 : i32
    scf.if %2 {
      %c0_8 = arith.constant 0 : index
      %c0_9 = arith.constant 0 : index
      %10 = vector.load %arg2[%c0_8, %c0_9] : memref<32x128xf32, #tpu.memory_space<vmem>>, vector<32x128xf32>
      %c0_10 = arith.constant 0 : index
      %c0_11 = arith.constant 0 : index
      %11 = vector.load %arg3[%c0_10, %c0_11] : memref<128x128xf32, #tpu.memory_space<vmem>>, vector<128x128xf32>
      %cst_12 = arith.constant dense<0.000000e+00> : vector<32x128xf32>
      %12 = tpu.matmul %10, %11, %cst_12 {dimension_numbers = #tpu.dot_dimension_numbers<[1], [0], [0], [1], [0, 0, 1, 1], [], []>} : vector<32x128xf32>, vector<128x128xf32>, vector<32x128xf32> -> vector<32x128xf32>
      %c0_13 = arith.constant 0 : index
      %c0_14 = arith.constant 0 : index
      %13 = vector.load %arg4[%c0_13, %c0_14] : memref<1x128xf32, #tpu.memory_space<vmem>>, vector<1x128xf32>
      %14 = vector.broadcast %13 : vector<1x128xf32> to vector<32x128xf32>
      %15 = arith.addf %12, %14 : vector<32x128xf32>
      %cst_15 = arith.constant 5.000000e-01 : f32
      %16 = vector.broadcast %cst_15 : f32 to vector<32x128xf32>
      %17 = arith.mulf %16, %15 : vector<32x128xf32>
      %cst_16 = arith.constant 0.707106769 : f32
      %18 = vector.broadcast %cst_16 : f32 to vector<32x128xf32>
      %19 = arith.mulf %15, %18 : vector<32x128xf32>
      %20 = math.erf %19 : vector<32x128xf32>
      %cst_17 = arith.constant 1.000000e+00 : f32
      %21 = vector.broadcast %cst_17 : f32 to vector<32x128xf32>
      %22 = arith.addf %21, %20 : vector<32x128xf32>
      %23 = arith.mulf %17, %22 : vector<32x128xf32>
      %cst_18 = arith.constant dense<0.000000e+00> : vector<32xf32>
      %24 = vector.multi_reduction <add>, %23, %cst_18 [1] : vector<32x128xf32> to vector<32xf32>
      %25 = vector.shape_cast %24 : vector<32xf32> to vector<32x1xf32>
      %cst_19 = arith.constant 9.600000e+01 : f32
      %26 = vector.broadcast %cst_19 : f32 to vector<32x1xf32>
      %27 = arith.divf %25, %26 : vector<32x1xf32>
      %28 = vector.broadcast %27 : vector<32x1xf32> to vector<32x128xf32>
      %29 = arith.subf %23, %28 : vector<32x128xf32>
      %30 = tpu.iota {dimensions = array<i32: 1>} : vector<1x128xi32>
      %c96_i32 = arith.constant 96 : i32
      %31 = vector.broadcast %c96_i32 : i32 to vector<1x128xi32>
      %32 = arith.cmpi slt, %30, %31 : vector<1x128xi32>
      %cst_20 = arith.constant 0.000000e+00 : f32
      %33 = vector.shape_cast %32 : vector<1x128xi1> to vector<1x128xi1>
      %34 = vector.broadcast %33 : vector<1x128xi1> to vector<32x128xi1>
      %35 = vector.broadcast %cst_20 : f32 to vector<32x128xf32>
      %36 = arith.select %34, %29, %35 : vector<32x128xi1>, vector<32x128xf32>
      %37 = arith.mulf %36, %36 : vector<32x128xf32>
      %cst_21 = arith.constant dense<0.000000e+00> : vector<32xf32>
      %38 = vector.multi_reduction <add>, %37, %cst_21 [1] : vector<32x128xf32> to vector<32xf32>
      %39 = vector.shape_cast %38 : vector<32xf32> to vector<32x1xf32>
      %cst_22 = arith.constant 9.600000e+01 : f32
      %40 = vector.broadcast %cst_22 : f32 to vector<32x1xf32>
      %41 = arith.divf %39, %40 : vector<32x1xf32>
      %cst_23 = arith.constant 9.99999997E-7 : f32
      %42 = vector.broadcast %cst_23 : f32 to vector<32x1xf32>
      %43 = arith.addf %41, %42 : vector<32x1xf32>
      %44 = math.rsqrt %43 : vector<32x1xf32>
      %45 = vector.broadcast %44 : vector<32x1xf32> to vector<32x128xf32>
      %46 = arith.mulf %36, %45 : vector<32x128xf32>
      %c0_24 = arith.constant 0 : index
      %c0_25 = arith.constant 0 : index
      %47 = vector.load %arg8[%c0_24, %c0_25] : memref<32x128xf32, #tpu.memory_space<vmem>>, vector<32x128xf32>
      tpu.vector_store %arg8[%c0_24, %c0_25], %46 {strides = array<i32>} : memref<32x128xf32, #tpu.memory_space<vmem>>, vector<32x128xf32>,
    } else {
    }
    %c0 = arith.constant 0 : index
    %c0_1 = arith.constant 0 : index
    %3 = vector.load %arg8[%c0, %c0_1] : memref<32x128xf32, #tpu.memory_space<vmem>>, vector<32x128xf32>
    %c0_2 = arith.constant 0 : index
    %c0_3 = arith.constant 0 : index
    %4 = vector.load %arg5[%c0_2, %c0_3] : memref<128x128xf32, #tpu.memory_space<vmem>>, vector<128x128xf32>
    %cst = arith.constant dense<0.000000e+00> : vector<32x128xf32>
    %5 = tpu.matmul %3, %4, %cst {dimension_numbers = #tpu.dot_dimension_numbers<[1], [0], [0], [1], [0, 0, 1, 1], [], []>} : vector<32x128xf32>, vector<128x128xf32>, vector<32x128xf32> -> vector<32x128xf32>
    %c0_4 = arith.constant 0 : index
    %c0_5 = arith.constant 0 : index
    %6 = vector.load %arg6[%c0_4, %c0_5] : memref<1x128xf32, #tpu.memory_space<vmem>>, vector<1x128xf32>
    %7 = vector.broadcast %6 : vector<1x128xf32> to vector<32x128xf32>
    %8 = arith.addf %5, %7 : vector<32x128xf32>
    %c0_6 = arith.constant 0 : index
    %c0_7 = arith.constant 0 : index
    %9 = vector.load %arg7[%c0_6, %c0_7] : memref<32x128xf32, #tpu.memory_space<vmem>>, vector<32x128xf32>
    tpu.vector_store %arg7[%c0_6, %c0_7], %8 {strides = array<i32>} : memref<32x128xf32, #tpu.memory_space<vmem>>, vector<32x128xf32>,
    return
  }
  func.func @transform_0(%arg0: i32, %arg1: i32) -> (i32, i32) {
    %c0_i32 = arith.constant 0 : i32
    %c0_i32_0 = arith.constant 0 : i32
    return %arg0, %c0_i32 : i32, i32
  }
  func.func @transform_1(%arg0: i32, %arg1: i32) -> (i32, i32) {
    %c0_i32 = arith.constant 0 : i32
    %c0_i32_0 = arith.constant 0 : i32
    %c0_i32_1 = arith.constant 0 : i32
    return %c0_i32, %c0_i32_0 : i32, i32
  }
  func.func @transform_2(%arg0: i32, %arg1: i32) -> (i32, i32) {
    %c0_i32 = arith.constant 0 : i32
    %c0_i32_0 = arith.constant 0 : i32
    %c0_i32_1 = arith.constant 0 : i32
    return %c0_i32, %c0_i32_0 : i32, i32
  }
  func.func @transform_3(%arg0: i32, %arg1: i32) -> (i32, i32) {
    %c0_i32 = arith.constant 0 : i32
    %c0_i32_0 = arith.constant 0 : i32
    return %c0_i32, %arg1 : i32, i32
  }
  func.func @transform_4(%arg0: i32, %arg1: i32) -> (i32, i32) {
    %c0_i32 = arith.constant 0 : i32
    %c0_i32_0 = arith.constant 0 : i32
    return %c0_i32, %arg1 : i32, i32
  }
  func.func @transform_5(%arg0: i32, %arg1: i32) -> (i32, i32) {
    %c0_i32 = arith.constant 0 : i32
    return %arg0, %arg1 : i32, i32
  }
}

</mosaic_0001>

<bundles_post_ra>
// kernel: tpu_custom_call.1
= control target key start
LH: loop header
LB: loop body
LE: loop exit
PB: predicated region body
PF: predicated region fallthrough
CT: control target
= control target key end

     0   :  { %s1434_s0 = inlined_call_operand.hbm [shape: f32[64,128], index: 0, kind: input, shape index: {}]   ;;  %s1435_s1 = inlined_call_operand.hbm [shape: f32[128,128], index: 1, kind: input, shape index: {}]   ;;  %s1436_s2 = inlined_call_operand.vmem [shape: f32[1,128], index: 2, kind: input, shape index: {}]   ;;  %s1437_s3 = inlined_call_operand.hbm [shape: f32[128,128], index: 3, kind: input, shape index: {}]   ;;  %s1438_s4 = inlined_call_operand.vmem [shape: f32[1,128], index: 4, kind: input, shape index: {}]   ;;  %s1439_s5 = inlined_call_operand.hbm [shape: f32[64,128], index: 5, kind: output, shape index: {}]  }
   0x1   :  { %1442 = sst [smem:[#allocation13_spill]] %s1435_s1 }
   0x2   :  { %10 = vsyncpa [#allocation4], 0 }
   0x3   :  { %12 = vsyncpa [#allocation4 + $0x1], 0 }
   0x4   :  { %13 = vsyncpa [#allocation7], 0 }
   0x5   :  { %14 = vsyncpa [#allocation5], 0 }
   0x6   :  { %16 = vsyncpa [#allocation5 + $0x1], 0  ;;  %s1197_s18 = smov 0   ;;  %s1199_s19 = smov 0  }
   0x7   :  { %s1201_s20 = smov 0   ;;  %s1203_s21 = smov 0  }
   0x8   :  { %s1205_s22 = smov 0   ;;  %s1207_s23 = smov 0  }
   0x9 LB: > { %s750_s24 = sadd.s32 4294967295, %s1157_s23   ;;  %s751_s25 = sadd.s32 4294967294, %s1157_s23   ;;  %s1157_s23 = sphi %s1207_s23, %s22_s23   ;;  %s1153_s22 = sphi %s1205_s22, %s1460_s22   ;;  %s1149_s21 = sphi %s1203_s21, %s1459_s21   ;;  %s1145_s20 = sphi %s1201_s20, %s1458_s20   ;;  %s1141_s19 = sphi %s1199_s19, %s1457_s19   ;;  %s1137_s18 = sphi %s1197_s18, %s1456_s18  }
   0xa   : > { %p54_p0 = scmp.ne.s32.totalorder %s1141_s19, %s1137_s18  ;;  %p1231_p1 = scmp.eq.s32.totalorder %s750_s24, 0 }
   0xb   : > { %p1235_p2 = scmp.eq.s32.totalorder %s750_s24, 1  ;;  %p180_p3 = scmp.eq.s32.totalorder %s751_s25, 1 }
   0xc   : > { %p1241_p4 = por %p1231_p1, %p54_p0  ;;  %p752_p5 = scmp.ge.s32.totalorder %s1157_s23, 1 }
   0xd   : > { %p1246_p6 = por %p180_p3, %p54_p0  ;;  %p187_p7 = scmp.lt.s32.totalorder %s1157_s23, 3 }
   0xe   : > { %s1159_s6 = smov [#allocation6]   ;;  %s1160_s9 = smov [#allocation8]  }
   0xf   : > { %s1446_s29 = scalar_select %p1246_p6, 1, 0 }
  0x10   : > { %p1251_p8 = pnand %p752_p5, %p187_p7  ;;  %s199_s7 = sshll.u32 %s1159_s6, 4  ;;  %s200_s7 = int_to_ptr.vmem [resolvable:$true] %s199_s7 }
  0x11   : > { %s217_s10 = sshll.u32 %s1160_s9, 4  ;;  %s1004_s11 = scalar_lea.vmem %s200_s7, 2048  ;;  %s218_s10 = int_to_ptr.vmem [resolvable:$true] %s217_s10 }
  0x12   : > { %p902_p9 = pneg %p1251_p8  ;;  %p1005_p13 = scmp.ne.s32.totalorder %s200_s7, %s1004_s11 }
  0x13   : > { %p1012_p5 = scmp.lt.s32.totalorder %s200_s7, %s200_s7  ;;  %p1013_p7 = scmp.lt.s32.totalorder %s1004_s11, %s1004_s11 }
  0x14   : > { %p1260_p11 = pnand %p902_p9, %p1231_p1 }
  0x15   : > { %p1014_p10 = por %p1013_p7, %p1012_p5 }
  0x16   : > { %p995_p12 = pneg %p1260_p11 }
  0x18   : > { %p1007_p0 = pnand %p1005_p13, %p995_p12 }
  0x1a   : > { %p1008_p3 = pneg %p1007_p0 }
  0x1c   : > { %p1015_p9 = pnand %p1014_p10, %p1008_p3 }
  0x1e   : > { %1018 = shalt.err (!%p1015_p9)
}
  0x1f   : > { %s1440_s12 = smov 128   ;;  %s1441_s13 = smov 8  }
  0x20   : > { %s1449_s1 = sld [smem:[#allocation13_spill]]  ;;  %s1030_s16 = scalar_lea.vmem %s218_s10, 2048 }
  0x21   : > { %p1031_p13 = scmp.ne.s32.totalorder %s218_s10, %s1030_s16  ;;  %p1038_p10 = scmp.lt.s32.totalorder %s218_s10, %s218_s10 }
  0x22   : > { %p1039_p3 = scmp.lt.s32.totalorder %s1030_s16, %s1030_s16 }
  0x23   : > { %p1033_p0 = pnand %p1031_p13, %p995_p12 }
  0x24   : > { %p1040_p7 = por %p1039_p3, %p1038_p10 }
  0x25   : > { %p1034_p5 = pneg %p1033_p0 }
  0x26   : > { %905 = dma.hbm_to_vmem [thread:$0]  (!%p1260_p11), %s1449_s1, 2048, %s200_s7, [#allocation7], %s1440_s12, %s1440_s12, %s1441_s13  }
  0x27   : > { %p1041_p9 = pnand %p1040_p7, %p1034_p5 }
  0x29   : > { %1044 = shalt.err (!%p1041_p9)
}
  0x2a   : > { %908 = dma.hbm_to_vmem [thread:$0]  (!%p1260_p11), %s1437_s3, 2048, %s218_s10, [#allocation7], %s1440_s12, %s1440_s12, %s1441_s13  }
  0x2b   : > { %s34_s25 = sadd.s32 1, %s1153_s22  ;;  %s41_s6 = sadd.s32 1, %s1145_s20 }
  0x2c   : > { %p36_p12 = scmp.ge.s32.totalorder %s34_s25, 2  ;;  %p48_p13 = scmp.ne.s32.totalorder %s1145_s20, %s1141_s19 }
  0x2d   : > { %p49_p0 = scmp.eq.s32.totalorder %s1157_s23, 0  ;;  %p919_p5 = scmp.lt.s32.totalorder %s1157_s23, 2 }
  0x2e   : > { %s1462_s25 = smov (%p36_p12, %s34_s25), 0  ;;  %p1298_p3 = por %p1235_p2, %p48_p13 }
  0x2f   : > { %p50_p10 = por %p49_p0, %p48_p13  ;;  %s38_s8 = ssub.s32 %s1153_s22, %s1462_s25 }
  0x30   : > { %s237_s9 = sand.u32 1, %s1145_s20   ;;  %p39_p7 = scmp.eq.s32.totalorder %s38_s8, 0 }
  0x31   : > { %s757_s10 = sshll.u32 %s237_s9, 5  ;;  %s772_s11 = sshll.u32 %s1153_s22, 9 }
  0x32   : > { %s1307_s14 = scalar_select %p39_p7, %s1145_s20, %s41_s6  }
  0x33   : > { %s247_s17 = scalar_lea.hbm %s1434_s0, %s772_s11  ;;  %s241_s24 = scalar_lea.vmem [#allocation3], %s757_s10 }
  0x34   : > { %s248_s12 = sshll.u32 %s241_s24, 4  ;;  %p1314_p11 = pnand %p919_p5, %p50_p10  ;;  %s249_s12 = int_to_ptr.vmem [resolvable:$true] %s248_s12 }
  0x35   : > { %s238_s13 = scalar_lea.sflag [#allocation4], %s237_s9  ;;  %s1058_s8 = scalar_lea.vmem %s249_s12, 512 }
  0x36   : > { %p1047_p2 = pneg %p1314_p11  ;;  %p1059_p9 = scmp.ne.s32.totalorder %s249_s12, %s1058_s8 }
  0x37   : > { %s1163_s6 = smov [#allocation3]  }
  0x38   : > { %p1061_p12 = pnand %p1059_p9, %p1047_p2  ;;  %s1063_s1 = sshll.u32 %s1163_s6, 4  ;;  %s1064_s1 = int_to_ptr.vmem [resolvable:$false] %s1063_s1 }
  0x39   : > { %s1065_s11 = scalar_lea.vmem %s1064_s1, 1024  ;;  %p1066_p0 = scmp.lt.s32.totalorder %s249_s12, %s1064_s1 }
  0x3a   : > { %p1062_p13 = pneg %p1061_p12  ;;  %p1067_p7 = scmp.lt.s32.totalorder %s1065_s11, %s1058_s8 }
  0x3c   : > { %p1068_p6 = por %p1067_p7, %p1066_p0 }
  0x3e   : > { %p1069_p5 = pnand %p1068_p6, %p1062_p13 }
  0x40   : > { %1072 = shalt.err (!%p1069_p5)
}
  0x41   : > { %s1452_s10 = smov 8   ;;  %s1453_s15 = smov 128  }
  0x42   : > { %912 = dma.hbm_to_vmem [thread:$0]  (!%p1314_p11), %s247_s17, 512, %s249_s12, %s238_s13, %s1453_s15, %s1453_s15, %s1452_s10  }
  0x43   : > { %260 = sbr.rel (%p1251_p8) target bundleno = 847 (0x34f), region = 40  ;;  %s1328_s9 = sand.u32 (!%p1251_p8), 1, %s1141_s19  }
  0x44   : > { %s761_s1 = sshll.u32 (!%p1251_p8), %s1328_s9, 5  ;;  %s263_s16 = scalar_lea.sflag (!%p1251_p8), [#allocation4], %s1328_s9 }
  0x45   : > { %s1334_s24 = scalar_lea.vmem (!%p1251_p8), [#allocation3], %s761_s1 }
  0x48   : > { %1124 = dma.done.wait (%p1241_p4), %s263_s16, 512  }
  0x49   : > { %1126 = vsyncadd (%p1241_p4), %s263_s16, 4294966784 }
  0x4a   : > { %1128 = dma.done.wait (%p1231_p1), [#allocation7], 4096  }
  0x4b   : > { %1130 = vsyncadd (%p1231_p1), [#allocation7], 4294963200  ;;  %v332_v0 = vld [vmem:[#allocation6 + $0x78] sm:$0xff]  ;;  %v331_v1 = vld [vmem:[#allocation6 + $0x70] sm:$0xff]  ;;  %v462_v53 = vlaneseq  ;;  %s303_s13 = scalar_lea.vmem [#allocation9], %s761_s1  ;;  %s773_s27 = sshll.u32 %s1149_s21, 9 }
  0x4c   : > { %814 = vmatprep.subr.mxu0 %v332_v0  ;;  %v330_v2 = vld [vmem:[#allocation6 + $0x68] sm:$0xff]  ;;  %v329_v3 = vld [vmem:[#allocation6 + $0x60] sm:$0xff]  ;;  %v328_v5 = vld [vmem:[#allocation6 + $0x58] sm:$0xff]  ;;  %s634_s17 = sshll.u32 %s303_s13, 4  ;;  %s1386_s11 = scalar_lea.hbm %s1439_s5, %s773_s27  ;;  %s1381_s17 = int_to_ptr.vmem [resolvable:$true] %s634_s17 }
  0x4d   : > { %815 = vmatpush3.msra.mxu0 %v332_v0  ;;  %v313_v4 = vld [vmem:[%s1334_s24] sm:$0xff]  ;;  %v327_v6 = vld [vmem:[#allocation6 + $0x50] sm:$0xff]  ;;  %v326_v7 = vld [vmem:[#allocation6 + $0x48] sm:$0xff]  ;;  %v463_v54 = vand.u32 127, %v462_v53  ;;  %s620_s10 = scalar_lea.sflag [#allocation5], %s1328_s9  ;;  %s1073_s15 = scalar_lea.vmem %s1381_s17, 512 }
  0x4e   : > { %816 = vmatprep.subr.mxu0 %v331_v1  ;;  %846 = vmatprep.mubr.f32.mxu0 %v313_v4  ;;  %v325_v8 = vld [vmem:[#allocation6 + $0x40] sm:$0xff]  ;;  %v324_v9 = vld [vmem:[#allocation6 + $0x38] sm:$0xff]  ;;  %v323_v10 = vld [vmem:[#allocation6 + $0x30] sm:$0xff]  ;;  %p1074_p1 = scmp.ne.s32.totalorder %s1381_s17, %s1073_s15  ;;  %s1164_s21 = smov [#allocation9]  }
  0x4f   : > { %817 = vmatpush3.msra.mxu0 %v331_v1  ;;  %v322_v11 = vld [vmem:[#allocation6 + $0x28] sm:$0xff]  ;;  %v321_v12 = vld [vmem:[#allocation6 + $0x20] sm:$0xff]  ;;  %v320_v13 = vld [vmem:[#allocation6 + $0x18] sm:$0xff]  ;;  %vm464_vm0 = vcmp.lt.s32.totalorder %v463_v54, 96  ;;  %s1077_s1 = sshll.u32 %s1164_s21, 4  ;;  %s1078_s1 = int_to_ptr.vmem [resolvable:$false] %s1077_s1 }
  0x50   : > { %818 = vmatprep.subr.mxu0 %v330_v2  ;;  %v319_v14 = vld [vmem:[#allocation6 + $0x10] sm:$0xff]  ;;  %v318_v15 = vld [vmem:[#allocation6 + $0x8] sm:$0xff]  ;;  %v317_v16 = vld [vmem:[#allocation6] sm:$0xff]  ;;  %p1075_p4 = pnand %p1074_p1, %p1298_p3  ;;  %s1079_s16 = scalar_lea.vmem %s1078_s1, 1024 }
  0x51   : > { %819 = vmatpush3.msra.mxu0 %v330_v2  ;;  %v314_v17 = vld [vmem:[%s1334_s24 + $0x8] sm:$0xff]  ;;  %v315_v18 = vld [vmem:[%s1334_s24 + $0x10] sm:$0xff]  ;;  %v316_v19 = vld [vmem:[%s1334_s24 + $0x18] sm:$0xff]  ;;  %p1080_p8 = scmp.lt.s32.totalorder %s1381_s17, %s1078_s1  ;;  %p1081_p10 = scmp.lt.s32.totalorder %s1079_s16, %s1073_s15 }
  0x52   : > { %820 = vmatprep.subr.mxu0 %v329_v3  ;;  %v765_v20 = vld [vmem:[%s1436_s2] ss:$0 sm:$0xff]  ;;  %v522_v49 = vld [vmem:[#allocation8 + $0x78] sm:$0xff]  ;;  %v521_v50 = vld [vmem:[#allocation8 + $0x70] sm:$0xff]  ;;  %p1076_p6 = pneg %p1075_p4 }
  0x53   : > { %821 = vmatpush3.msra.mxu0 %v329_v3  ;;  %852 = vmatprep.subr.mxu1 %v522_v49  ;;  %v520_v51 = vld [vmem:[#allocation8 + $0x68] sm:$0xff]  ;;  %v519_v52 = vld [vmem:[#allocation8 + $0x60] sm:$0xff]  ;;  %p1082_p11 = por %p1081_p10, %p1080_p8 }
  0x54   : > { %822 = vmatprep.subr.mxu0 %v328_v5  ;;  %853 = vmatpush3.msra.mxu1 %v522_v49 }
  0x55   : > { %823 = vmatpush3.msra.mxu0 %v328_v5  ;;  %854 = vmatprep.subr.mxu1 %v521_v50  ;;  %p1083_p2 = pnand %p1082_p11, %p1076_p6 }
  0x56   : > { %824 = vmatprep.subr.mxu0 %v327_v6  ;;  %855 = vmatpush3.msra.mxu1 %v521_v50 }
  0x57   : > { %825 = vmatpush3.msra.mxu0 %v327_v6  ;;  %856 = vmatprep.subr.mxu1 %v520_v51 }
  0x58   : > { %826 = vmatprep.subr.mxu0 %v326_v7  ;;  %857 = vmatpush3.msra.mxu1 %v520_v51 }
  0x59   : > { %827 = vmatpush3.msra.mxu0 %v326_v7  ;;  %858 = vmatprep.subr.mxu1 %v519_v52 }
  0x5a   : > { %828 = vmatprep.subr.mxu0 %v325_v8  ;;  %859 = vmatpush3.msra.mxu1 %v519_v52 }
  0x5b   : > { %829 = vmatpush3.msra.mxu0 %v325_v8 }
  0x5c   : > { %830 = vmatprep.subr.mxu0 %v324_v9 }
  0x5d   : > { %831 = vmatpush3.msra.mxu0 %v324_v9 }
  0x5e   : > { %832 = vmatprep.subr.mxu0 %v323_v10 }
  0x5f   : > { %833 = vmatpush3.msra.mxu0 %v323_v10 }
  0x60   : > { %834 = vmatprep.subr.mxu0 %v322_v11 }
  0x61   : > { %835 = vmatpush3.msra.mxu0 %v322_v11  ;;  %v518_v11 = vld [vmem:[#allocation8 + $0x58] sm:$0xff] }
  0x62   : > { %836 = vmatprep.subr.mxu0 %v321_v12  ;;  %860 = vmatprep.subr.mxu1 %v518_v11 }
  0x63   : > { %837 = vmatpush3.msra.mxu0 %v321_v12  ;;  %861 = vmatpush3.msra.mxu1 %v518_v11  ;;  %v517_v12 = vld [vmem:[#allocation8 + $0x50] sm:$0xff] }
  0x64   : > { %838 = vmatprep.subr.mxu0 %v320_v13  ;;  %862 = vmatprep.subr.mxu1 %v517_v12 }
  0x65   : > { %839 = vmatpush3.msra.mxu0 %v320_v13  ;;  %863 = vmatpush3.msra.mxu1 %v517_v12  ;;  %v516_v13 = vld [vmem:[#allocation8 + $0x48] sm:$0xff] }
  0x66   : > { %840 = vmatprep.subr.mxu0 %v319_v14  ;;  %864 = vmatprep.subr.mxu1 %v516_v13 }
  0x67   : > { %841 = vmatpush3.msra.mxu0 %v319_v14  ;;  %865 = vmatpush3.msra.mxu1 %v516_v13  ;;  %v515_v14 = vld [vmem:[#allocation8 + $0x40] sm:$0xff] }
  0x68   : > { %842 = vmatprep.subr.mxu0 %v318_v15  ;;  %866 = vmatprep.subr.mxu1 %v515_v14 }
  0x69   : > { %843 = vmatpush3.msra.mxu0 %v318_v15  ;;  %867 = vmatpush3.msra.mxu1 %v515_v14  ;;  %v514_v15 = vld [vmem:[#allocation8 + $0x38] sm:$0xff] }
  0x6a   : > { %844 = vmatprep.subr.mxu0 %v317_v16  ;;  %868 = vmatprep.subr.mxu1 %v514_v15 }
  0x6b   : > { %845 = vmatpush3.msra.mxu0 %v317_v16  ;;  %869 = vmatpush3.msra.mxu1 %v514_v15  ;;  %v513_v16 = vld [vmem:[#allocation8 + $0x30] sm:$0xff] }
  0x6c   : > { %847 = vmatmul.mubr.f32.vlgmr.msra.gmra.mxu0 %v314_v17  ;;  %870 = vmatprep.subr.mxu1 %v513_v16  ;;  %v512_v17 = vld [vmem:[#allocation8 + $0x28] sm:$0xff] }
  0x6d   : > { %849 = vmatprep.mubr.f32.mxu0 %v315_v18  ;;  %871 = vmatpush3.msra.mxu1 %v513_v16  ;;  %v511_v18 = vld [vmem:[#allocation8 + $0x20] sm:$0xff] }
  0x6e   : > { %872 = vmatprep.subr.mxu1 %v512_v17 }
  0x6f   : > { %873 = vmatpush3.msra.mxu1 %v512_v17 }
  0x70   : > { %850 = vmatmul.mubr.f32.gmra.mxu0 %v316_v19  ;;  %v510_v19 = vld [vmem:[#allocation8 + $0x18] sm:$0xff]  ;;  %874 = vmatprep.subr.mxu1 %v511_v18 }
  0x71   : > { %875 = vmatpush3.msra.mxu1 %v511_v18 }
  0x72   : > { %876 = vmatprep.subr.mxu1 %v510_v19 }
  0x73   : > { %877 = vmatpush3.msra.mxu1 %v510_v19 }
 0x12c   : > { %v848_v21 = vpop.f32.mrf.mxu0 }
 0x12d   : > { %v412_v22 = vadd.f32 %v848_v21, %v765_v20  ;;  %v508_v21 = vld [vmem:[#allocation8 + $0x8] sm:$0xff] }
 0x12e   : > { %v406_v23 = vpop.f32.mrf.mxu0 }
 0x12f   : > { %v430_v24 = vmul.f32 0.70710677, %v412_v22  ;;  %v407_v25 = vadd.f32 %v765_v20, %v406_v23  ;;  %v426_v41 = vmul.f32 0.5, %v412_v22  ;;  %v507_v22 = vld [vmem:[#allocation8] sm:$0xff] }
 0x130   : > { %v851_v26 = vpop.f32.mrf.mxu0 }
 0x131   : > { %v429_v27 = vmul.f32 0.70710677, %v407_v25  ;;  %v422_v28 = vadd.f32 %v851_v26, %v765_v20  ;;  %977 = verf.f32 %v430_v24  ;;  %v425_v35 = vmul.f32 0.5, %v407_v25 }
 0x132   : > { %v416_v29 = vpop.f32.mrf.mxu0 }
 0x133   : > { %979 = verf.f32 %v429_v27  ;;  %v432_v30 = vmul.f32 0.70710677, %v422_v28  ;;  %v417_v31 = vadd.f32 %v765_v20, %v416_v29  ;;  %v428_v47 = vmul.f32 0.5, %v422_v28  ;;  %v509_v20 = vld [vmem:[#allocation8 + $0x10] sm:$0xff] }
 0x134   : > { %878 = vmatprep.subr.mxu1 %v509_v20 }
 0x135   : > { %v431_v32 = vmul.f32 0.70710677, %v417_v31  ;;  %981 = verf.f32 %v432_v30  ;;  %v427_v42 = vmul.f32 0.5, %v417_v31  ;;  %879 = vmatpush3.msra.mxu1 %v509_v20 }
 0x136   : > { %880 = vmatprep.subr.mxu1 %v508_v21 }
 0x137   : > { %983 = verf.f32 %v431_v32  ;;  %881 = vmatpush3.msra.mxu1 %v508_v21 }
 0x138   : > { %882 = vmatprep.subr.mxu1 %v507_v22 }
 0x139   : > { %883 = vmatpush3.msra.mxu1 %v507_v22 }
 0x13e   : > { %v978_v33 = vpop.eup %977 }
 0x13f   : > { %v438_v39 = vadd.f32 1.0, %v978_v33 }
 0x140   : > { %v980_v34 = vpop.eup %979 }
 0x141   : > { %v437_v36 = vadd.f32 1.0, %v980_v34  ;;  %v442_v45 = vmul.f32 %v438_v39, %v426_v41 }
 0x142   : > { %v982_v37 = vpop.eup %981 }
 0x143   : > { %v441_v38 = vmul.f32 %v437_v36, %v425_v35  ;;  %v440_v46 = vadd.f32 1.0, %v982_v37 }
 0x144   : > { %v984_v40 = vpop.eup %983 }
 0x145   : > { %445 = vadd.xlane.f32.xlu0 %v441_v38  ;;  %v439_v43 = vadd.f32 1.0, %v984_v40  ;;  %v444_v48 = vmul.f32 %v440_v46, %v428_v47 }
 0x147   : > { %v443_v44 = vmul.f32 %v439_v43, %v427_v42  ;;  %v766_v43 = vld [vmem:[%s1438_s4] ss:$0 sm:$0xff] }
 0x149   : > { %449 = vadd.xlane.f32.xlu1 %v443_v44  ;;  %447 = vadd.xlane.f32.xlu0 %v442_v45 }
 0x14d   : > { %451 = vadd.xlane.f32.xlu1 %v444_v48 }
 0x1ce   : > { %v446_v55 = vpop.xlane.xlu0 %445 }
 0x1cf   : > { %v454_v56 = vmul.f32 0.010416667, %v446_v55 }
 0x1d1   : > { %v458_v57 = vsub.f32 %v441_v38, %v454_v56 }
 0x1d2   : > { %v450_v58 = vpop.xlane.xlu1 %449  ;;  %v448_v59 = vpop.xlane.xlu0 %447 }
 0x1d3   : > { %v456_v60 = vmul.f32 0.010416667, %v450_v58  ;;  %v455_v61 = vmul.f32 0.010416667, %v448_v59  ;;  %v1352_v62 = vsel %vm464_vm0, %v458_v57, 0.0 }
 0x1d4   : > { %v471_v63 = vmul.f32 %v1352_v62, %v1352_v62 }
 0x1d5   : > { %v460_v0 = vsub.f32 %v443_v44, %v456_v60  ;;  %v459_v1 = vsub.f32 %v442_v45, %v455_v61 }
 0x1d6   : > { %v452_v2 = vpop.xlane.xlu1 %451  ;;  %475 = vadd.xlane.f32.xlu0 %v471_v63 }
 0x1d7   : > { %v457_v3 = vmul.f32 0.010416667, %v452_v2  ;;  %v1357_v4 = vsel %vm464_vm0, %v460_v0, 0.0  ;;  %v1360_v5 = vsel %vm464_vm0, %v459_v1, 0.0 }
 0x1d8   : > { %v473_v6 = vmul.f32 %v1357_v4, %v1357_v4  ;;  %v472_v7 = vmul.f32 %v1360_v5, %v1360_v5 }
 0x1d9   : > { %v461_v8 = vsub.f32 %v444_v48, %v457_v3 }
 0x1da   : > { %479 = vadd.xlane.f32.xlu0 %v473_v6  ;;  %477 = vadd.xlane.f32.xlu1 %v472_v7 }
 0x1db   : > { %v1367_v9 = vsel %vm464_vm0, %v461_v8, 0.0 }
 0x1dc   : > { %v474_v10 = vmul.f32 %v1367_v9, %v1367_v9 }
 0x1de   : > { %481 = vadd.xlane.f32.xlu1 %v474_v10 }
 0x25f   : > { %v476_v23 = vpop.xlane.xlu0 %475 }
 0x260   : > { %v483_v24 = vmul.f32 0.010416667, %v476_v23 }
 0x262   : > { %v487_v25 = vadd.f32 1e-06, %v483_v24 }
 0x263   : > { %v478_v26 = vpop.xlane.xlu1 %477  ;;  %v480_v27 = vpop.xlane.xlu0 %479 }
 0x264   : > { %985 = vrsqrt.f32 %v487_v25  ;;  %v484_v28 = vmul.f32 0.010416667, %v478_v26  ;;  %v485_v29 = vmul.f32 0.010416667, %v480_v27 }
 0x266   : > { %v488_v30 = vadd.f32 1e-06, %v484_v28  ;;  %v489_v31 = vadd.f32 1e-06, %v485_v29 }
 0x267   : > { %v482_v32 = vpop.xlane.xlu1 %481 }
 0x268   : > { %987 = vrsqrt.f32 %v488_v30  ;;  %v486_v33 = vmul.f32 0.010416667, %v482_v32 }
 0x269   : > { %989 = vrsqrt.f32 %v489_v31 }
 0x26a   : > { %v490_v34 = vadd.f32 1e-06, %v486_v33 }
 0x26c   : > { %991 = vrsqrt.f32 %v490_v34 }
 0x271   : > { %v986_v35 = vpop.eup %985 }
 0x272   : > { %v495_v36 = vmul.f32 %v986_v35, %v1352_v62 }
 0x274   : > { %884 = vmatprep.mubr.f32.mxu1 %v495_v36 }
 0x275   : > { %v988_v37 = vpop.eup %987 }
 0x276   : > { %v990_v38 = vpop.eup %989  ;;  %v496_v39 = vmul.f32 %v988_v37, %v1360_v5 }
 0x277   : > { %v497_v40 = vmul.f32 %v990_v38, %v1357_v4 }
 0x278   : > { %885 = vmatmul.mubr.f32.vlgmr.msra.gmra.mxu1 %v496_v39 }
 0x279   : > { %v992_v41 = vpop.eup %991  ;;  %887 = vmatprep.mubr.f32.mxu1 %v497_v40 }
 0x27a   : > { %v498_v42 = vmul.f32 %v992_v41, %v1367_v9 }
 0x27c   : > { %888 = vmatmul.mubr.f32.gmra.mxu1 %v498_v42 }
 0x338   : > { %v886_v44 = vpop.f32.mrf.mxu1 }
 0x339   : > { %v602_v45 = vadd.f32 %v886_v44, %v766_v43 }
 0x33a   : > { %v596_v46 = vpop.f32.mrf.mxu1 }
 0x33b   : > { %616 = vst [vmem:[%s303_s13 + $0x8] sm:$0xff] %v602_v45  ;;  %v597_v47 = vadd.f32 %v766_v43, %v596_v46 }
 0x33c   : > { %v889_v48 = vpop.f32.mrf.mxu1 }
 0x33d   : > { %615 = vst [vmem:[%s303_s13] sm:$0xff] %v597_v47  ;;  %v612_v49 = vadd.f32 %v889_v48, %v766_v43 }
 0x33e   : > { %v606_v50 = vpop.f32.mrf.mxu1 }
 0x33f   : > { %618 = vst [vmem:[%s303_s13 + $0x18] sm:$0xff] %v612_v49  ;;  %v607_v51 = vadd.f32 %v766_v43, %v606_v50 }
 0x341   : > { %617 = vst [vmem:[%s303_s13 + $0x10] sm:$0xff] %v607_v51 }
 0x342   : > { %1086 = shalt.err (!%p1083_p2)
}
 0x343   : > { %s1087_s24 = scalar_lea.hbm %s1386_s11, 512  ;;  %s1091_s30 = scalar_lea.hbm %s1439_s5, 1024 }
 0x344   : > { %p1088_p9 = scmp.ne.s32.totalorder %s1386_s11, %s1087_s24  ;;  %p1092_p0 = scmp.lt.s32.totalorder %s1386_s11, %s1439_s5 }
 0x345   : > { %p1093_p7 = scmp.lt.s32.totalorder %s1091_s30, %s1087_s24 }
 0x346   : > { %p1089_p12 = pnand %p1088_p9, %p1298_p3 }
 0x347   : > { %p1094_p5 = por %p1093_p7, %p1092_p0 }
 0x348   : > { %p1090_p13 = pneg %p1089_p12 }
 0x34a   : > { %p1095_p1 = pnand %p1094_p5, %p1090_p13 }
 0x34c   : > { %1098 = shalt.err (!%p1095_p1)
}
 0x34d   : > { %s1165_s27 = smov 128   ;;  %s1166_s8 = smov 8  }
 0x34e   : > { %900 = dma.vmem_to_hbm [thread:$0]  (%p1298_p3), %s1381_s17, 512, %s1386_s11, %s620_s10, %s1165_s27, %s1165_s27, %s1166_s8  }
 0x34f PF: > { %s649_s6 = sand.u32 1, %s1137_s18   ;;  %p1454_p4 = scmp.ne.s32.totalorder %s1446_s29, 0 }
 0x350   : > { %p1455_p6 = scmp.ge.s32.totalorder %s1157_s23, 2  ;;  %s650_s15 = scalar_lea.sflag [#allocation5], %s649_s6 }
 0x352   : > { %p914_p8 = pnand %p1455_p6, %p1454_p4 }
 0x354   : > { %p915_p10 = pneg %p914_p8 }
 0x356   : > { %1132 = dma.done.wait (%p915_p10), %s650_s15, 512  }
 0x357   : > { %1134 = vsyncadd (%p915_p10), %s650_s15, 4294966784  ;;  %s22_s23 = sadd.s32 1, %s1157_s23   ;;  %s1456_s18 = smov %s1141_s19 }
 0x358   : > { %p19_p11 = scmp.ge.s32.totalorder %s22_s23, 4   ;;  %s1457_s19 = smov %s1145_s20 }
 0x359   : > { %s1458_s20 = smov %s1307_s14  ;;  %s1459_s21 = smov %s1153_s22 }
 0x35a   : > { %s1460_s22 = smov %s1462_s25  ;;  %21 = sbr.rel (!%p19_p11) target bundleno = 9 (0x9), region = 101 }
 0x35f   :  { %655 = vsyncpa [#allocation4], 1 }
 0x360   :  { %657 = vsyncpa [#allocation4 + $0x1], 1 }
 0x361   :  { %658 = vsyncpa [#allocation7], 1 }
 0x362   :  { %659 = vsyncpa [#allocation5], 1 }
 0x363   :  { %661 = vsyncpa [#allocation5 + $0x1], 1 }

</bundles_post_ra>
